<compile_context>
chip_gen: v5e
topology: v5e:2x2
jax: 0.10.0
libtpu: 0.0.40
codegen_flags: <defaults>
</compile_context>

<pallas_src>
import functools

import jax
import jax.numpy as jnp
import numpy as np
from jax.experimental import pallas as pl
from jax.experimental.pallas import tpu as pltpu

LANES = 128


def _softplus(x):
    # softplus(x) = log(1 + exp(x)); stable form, log arg stays in [1, 2].
    return jnp.maximum(x, 0.0) + jnp.log(1.0 + jnp.exp(-jnp.abs(x)))


def nce_kernel(flag_ref, bd_ref, ids_ref, repr_g_ref, repr_d_ref,
               wg_ref, bg_ref, wd_ref, loss_ref,
               m_sc, l_sc, t_sc, *, n, k, v_tile):
    v = pl.program_id(0)
    s = repr_g_ref.shape[0]
    n_chunks = v_tile // LANES

    @pl.when(v == 0)
    def _init():
        m_sc[...] = jnp.full_like(m_sc, -jnp.inf)
        l_sc[...] = jnp.zeros_like(l_sc)
        t_sc[...] = jnp.zeros_like(t_sc)

    # --- generator head over one vocab tile:
    #     logits = repr_g @ Wg[:, tile] + bg[tile]                [S, v_tile] f32
    logits = jnp.dot(repr_g_ref[...], wg_ref[...],
                     preferred_element_type=jnp.float32)
    logits = logits + bg_ref[pl.ds(v, 1), :].astype(jnp.float32)

    # Split the tile into 128-lane chunks; everything below is elementwise on
    # (S, 128) vregs (VPU/EUP only, no per-tile cross-lane XLU reductions).
    chunks = [logits[:, c * LANES:(c + 1) * LANES] for c in range(n_chunks)]

    # --- per-lane online log-sum-exp across vocab tiles ---
    tile_max = chunks[0]
    for c in range(1, n_chunks):
        tile_max = jnp.maximum(tile_max, chunks[c])
    m_prev = m_sc[...]
    m_new = jnp.maximum(m_prev, tile_max)
    ssum = jnp.exp(chunks[0] - m_new)
    for c in range(1, n_chunks):
        ssum = ssum + jnp.exp(chunks[c] - m_new)
    l_sc[...] = l_sc[...] * jnp.exp(m_prev - m_new) + ssum
    m_sc[...] = m_new

    # --- per-lane target-logit gather (global col = v*v_tile + c*128 + lane) ---
    lane = jax.lax.broadcasted_iota(jnp.int32, (s, LANES), 1)
    shifted = ids_ref[...] - v * v_tile                       # (S, 1) int32
    t_acc = t_sc[...]
    for c in range(n_chunks):
        t_acc = t_acc + jnp.where(lane == (shifted - c * LANES), chunks[c], 0.0)
    t_sc[...] = t_acc

    # --- finalize: single cross-lane reduce + log-space NCE loss ---
    @pl.when(v == pl.num_programs(0) - 1)
    def _fin():
        m = m_sc[...]
        row_m = jnp.max(m, axis=-1, keepdims=True)                      # (S, 1)
        row_l = jnp.sum(l_sc[...] * jnp.exp(m - row_m),
                        axis=-1, keepdims=True)                         # (S, 1)
        lse = row_m + jnp.log(row_l)                                    # (S, 1)
        t_row = jnp.sum(t_sc[...], axis=-1, keepdims=True)              # (S, 1)
        # TODO(synk): mask padded rows here if S is ever padded to a tile multiple.
        log_q = jnp.sum(t_row - lse, keepdims=True)                     # (1, 1)

        # Discriminator head on the [CLS] (position-0) representation, matching
        # PyTorch's discriminator_linear(repr_vec[0, :]):  E scalar, log p_hat = -E.
        cls = repr_d_ref[0:1, :]                                        # (1, H)
        e = jnp.sum(cls * wd_ref[...], axis=-1, keepdims=True) + bd_ref[0]
        log_p_hat = -e                                                  # (1, 1)

        log_n = jnp.log(jnp.float32(n))
        log_k = jnp.log(jnp.float32(k))
        diff = (log_k + log_q) - (log_n + log_p_hat)                    # (1, 1)
        loss_data = _softplus(diff)     # == -log(n*p_hat / (n*p_hat + k*q))
        loss_noise = _softplus(-diff)   # == -log(k*q    / (n*p_hat + k*q))
        loss_ref[...] = jnp.where(flag_ref[0] > 0, loss_data, loss_noise)


def _vmem_limit_bytes(s, h, v, v_tile, wg_itemsize, repr_g_itemsize):
    stream = 2 * h * v_tile * wg_itemsize                 # double-buffered Wg tile
    resident = 2 * (s * h * repr_g_itemsize               # repr_g
                    + s * h * 4                           # repr_d (f32)
                    + s * 4                               # ids
                    + h * 4                               # wd
                    + v * 4)                              # bg (resident)
    scratch = 3 * s * LANES * 4
    work = 4 * s * v_tile * 4                             # logits + exp temporaries
    need = stream + resident + scratch + work
    # 2x headroom for compiler temporaries; cap well inside v7x's 64 MiB VMEM.
    return int(min(max(2 * need, 8 * 1024 * 1024), 48 * 1024 * 1024))


def energy_nce_forward(flag, bd, ids, repr_g, repr_d, wg, bg, wd,
                       *, n, k, v_tile=512):
    S, H = repr_g.shape
    V = wg.shape[1]
    v_tile = min(v_tile, V)
    assert v_tile % LANES == 0, "vocab tile must be a multiple of 128 lanes"
    assert V % v_tile == 0, "vocab must be a multiple of the vocab tile"
    n_tiles = V // v_tile

    # Resident bias, reshaped so the kernel slices one row per vocab tile.
    bg2 = jnp.reshape(bg, (n_tiles, v_tile))

    kern = functools.partial(nce_kernel, n=float(n), k=float(k), v_tile=v_tile)

    cost = pl.CostEstimate(
        flops=2 * S * H * V,
        transcendentals=S * V + 2 * S * LANES * n_tiles,   # chunk exps + LSE rescales
        bytes_accessed=(wg.size * wg.dtype.itemsize
                        + bg.size * bg.dtype.itemsize
                        + repr_g.size * repr_g.dtype.itemsize
                        + repr_d.size * repr_d.dtype.itemsize
                        + ids.size * 4 + wd.size * 4 + 4))

    return pl.pallas_call(
        kern,
        out_shape=jax.ShapeDtypeStruct((1, 1), jnp.float32),
        grid=(n_tiles,),
        in_specs=[
            pl.BlockSpec(memory_space=pltpu.MemorySpace.SMEM),       # flag  (1,) int32
            pl.BlockSpec(memory_space=pltpu.MemorySpace.SMEM),       # bd    (1,) f32
            pl.BlockSpec((S, 1), lambda v: (0, 0)),                  # ids     resident
            pl.BlockSpec((S, H), lambda v: (0, 0)),                  # repr_g  resident
            pl.BlockSpec((S, H), lambda v: (0, 0)),                  # repr_d  resident
            pl.BlockSpec((H, v_tile), lambda v: (0, v)),             # wg tile streamed over V
            pl.BlockSpec((n_tiles, v_tile), lambda v: (0, 0)),       # bg      resident
            pl.BlockSpec((1, H), lambda v: (0, 0)),                  # wd      resident
        ],
        out_specs=pl.BlockSpec((1, 1), lambda v: (0, 0)),
        scratch_shapes=[pltpu.VMEM((S, LANES), jnp.float32),         # per-lane running max
                        pltpu.VMEM((S, LANES), jnp.float32),         # per-lane running sum-exp
                        pltpu.VMEM((S, LANES), jnp.float32)],        # per-lane target-logit sum
        compiler_params=pltpu.CompilerParams(
            dimension_semantics=("arbitrary",),                      # V axis is a reduction
            vmem_limit_bytes=_vmem_limit_bytes(
                S, H, V, v_tile, wg.dtype.itemsize, repr_g.dtype.itemsize)),
        cost_estimate=cost,
    )(flag, bd, ids, repr_g, repr_d, wg, bg2, wd)


if __name__ == "__main__":
    # Small, module-consistent shapes: seq=8, hidden=32, vocab=2048, n=3, k=7.
    S, H, V = 8, 32, 2048
    n, k = 3, 7
    V_TILE = 512   # multiple of 128; raise to 2048 on 128 MiB-VMEM v5e/v6e

    key = jax.random.PRNGKey(0)
    k_rg, k_rd, k_wg, k_bg, k_wd, k_bd, k_ids, k_branch = jax.random.split(key, 8)

    # Stand-ins for BERT last_hidden_state representations (see TODO above).
    repr_g = jax.random.normal(k_rg, (S, H), jnp.float32)
    repr_d = jax.random.normal(k_rd, (S, H), jnp.float32)

    # Deterministic linear-layer params (PyTorch-style uniform(-1/sqrt(fan_in), ..)).
    lim = 1.0 / jnp.sqrt(jnp.float32(H))
    wg = jax.random.uniform(k_wg, (H, V), jnp.float32, -lim, lim)   # generator_linear.weight^T
    bg = jax.random.uniform(k_bg, (V,), jnp.float32, -lim, lim)     # generator_linear.bias (f32)
    wd = jax.random.uniform(k_wd, (1, H), jnp.float32, -lim, lim)   # discriminator_linear.weight
    bd = jax.random.uniform(k_bd, (1,), jnp.float32, -lim, lim)     # discriminator_linear.bias

    # Input token ids for the noise probability q of the input sequence.
    ids = jax.random.randint(k_ids, (S, 1), 0, V, jnp.int32)

    # Host-side draw mimicking `random.random() < Pc0` in forward().
    Pc0 = n / (n + k)
    flag = (jax.random.uniform(k_branch, ()) < Pc0).astype(jnp.int32).reshape(1)

    # bf16 operands for the MXU-facing generator matmul; accumulation stays f32.
    repr_g_bf16 = repr_g.astype(jnp.bfloat16)
    wg_bf16 = wg.astype(jnp.bfloat16)

    loss = energy_nce_forward(flag, bd, ids, repr_g_bf16, repr_d,
                              wg_bf16, bg, wd, n=n, k=k, v_tile=V_TILE)
    loss = jax.block_until_ready(loss)

    # Pure-JAX reference (same bf16 operand precision, f32 math throughout).
    logits_ref = (repr_g_bf16.astype(jnp.float32) @ wg_bf16.astype(jnp.float32)
                  + bg[None, :])
    log_probs = jax.nn.log_softmax(logits_ref, axis=-1)
    log_q_ref = jnp.sum(jnp.take_along_axis(log_probs, ids, axis=-1))
    e_ref = jnp.sum(repr_d[0] * wd[0]) + bd[0]
    diff_ref = (jnp.log(float(k)) + log_q_ref) - (jnp.log(float(n)) + (-e_ref))
    loss_ref_val = jnp.where(flag[0] > 0, jax.nn.softplus(diff_ref),
                             jax.nn.softplus(-diff_ref))

    assert loss.shape == (1, 1) and bool(jnp.isfinite(loss[0, 0]))
    np.testing.assert_allclose(np.asarray(loss)[0, 0], float(loss_ref_val),
                               rtol=2e-3, atol=2e-3)
    print("KERNEL_OK")
</pallas_src>

<mosaic_0001>
module attributes {stable_mosaic.version = 11 : i64} {
  func.func @nce_kernel(%arg0: i32, %arg1: memref<1xi32, #tpu.memory_space<smem>>, %arg2: memref<1xf32, #tpu.memory_space<smem>>, %arg3: memref<8x1xi32, #tpu.memory_space<vmem>>, %arg4: memref<8x32xbf16, #tpu.memory_space<vmem>>, %arg5: memref<8x32xf32, #tpu.memory_space<vmem>>, %arg6: memref<32x512xbf16, #tpu.memory_space<vmem>>, %arg7: memref<4x512xf32, #tpu.memory_space<vmem>>, %arg8: memref<1x32xf32, #tpu.memory_space<vmem>>, %arg9: memref<1x1xf32, #tpu.memory_space<vmem>>, %arg10: memref<8x128xf32, #tpu.memory_space<vmem>>, %arg11: memref<8x128xf32, #tpu.memory_space<vmem>>, %arg12: memref<8x128xf32, #tpu.memory_space<vmem>>) attributes {dimension_semantics = [#tpu.dimension_semantics<arbitrary>], iteration_bounds = array<i64: 4>, scalar_prefetch = 0 : i64, scratch_operands = 3 : i64, tpu.core_type = #tpu.core_type<tc>, window_params = [{transform_indices = @transform_0, window_bounds = array<i64: 1>}, {transform_indices = @transform_1, window_bounds = array<i64: 1>}, {pipeline_mode = #tpu.pipeline_mode<synchronous>, transform_indices = @transform_2, window_bounds = array<i64: 8, 1>}, {pipeline_mode = #tpu.pipeline_mode<synchronous>, transform_indices = @transform_3, window_bounds = array<i64: 8, 32>}, {pipeline_mode = #tpu.pipeline_mode<synchronous>, transform_indices = @transform_4, window_bounds = array<i64: 8, 32>}, {transform_indices = @transform_5, window_bounds = array<i64: 32, 512>}, {pipeline_mode = #tpu.pipeline_mode<synchronous>, transform_indices = @transform_6, window_bounds = array<i64: 4, 512>}, {pipeline_mode = #tpu.pipeline_mode<synchronous>, transform_indices = @transform_7, window_bounds = array<i64: 1, 32>}, {pipeline_mode = #tpu.pipeline_mode<synchronous>, transform_indices = @transform_8, window_bounds = array<i64: 1, 1>}]} {
    %c0_i32 = arith.constant 0 : i32
    %0 = arith.cmpi eq, %arg0, %c0_i32 : i32
    %1 = arith.extui %0 : i1 to i32
    %c0_i32_0 = arith.constant 0 : i32
    %2 = arith.cmpi ne, %1, %c0_i32_0 : i32
    scf.if %2 {
      %cst_25 = arith.constant 0xFF800000 : f32
      %75 = vector.broadcast %cst_25 : f32 to vector<8x128xf32>
      %c0_26 = arith.constant 0 : index
      %c0_27 = arith.constant 0 : index
      %76 = vector.load %arg10[%c0_26, %c0_27] : memref<8x128xf32, #tpu.memory_space<vmem>>, vector<8x128xf32>
      tpu.vector_store %arg10[%c0_26, %c0_27], %75 {strides = array<i32>} : memref<8x128xf32, #tpu.memory_space<vmem>>, vector<8x128xf32>,
      %cst_28 = arith.constant 0.000000e+00 : f32
      %77 = vector.broadcast %cst_28 : f32 to vector<8x128xf32>
      %c0_29 = arith.constant 0 : index
      %c0_30 = arith.constant 0 : index
      %78 = vector.load %arg11[%c0_29, %c0_30] : memref<8x128xf32, #tpu.memory_space<vmem>>, vector<8x128xf32>
      tpu.vector_store %arg11[%c0_29, %c0_30], %77 {strides = array<i32>} : memref<8x128xf32, #tpu.memory_space<vmem>>, vector<8x128xf32>,
      %cst_31 = arith.constant 0.000000e+00 : f32
      %79 = vector.broadcast %cst_31 : f32 to vector<8x128xf32>
      %c0_32 = arith.constant 0 : index
      %c0_33 = arith.constant 0 : index
      %80 = vector.load %arg12[%c0_32, %c0_33] : memref<8x128xf32, #tpu.memory_space<vmem>>, vector<8x128xf32>
      tpu.vector_store %arg12[%c0_32, %c0_33], %79 {strides = array<i32>} : memref<8x128xf32, #tpu.memory_space<vmem>>, vector<8x128xf32>,
    } else {
    }
    %c0 = arith.constant 0 : index
    %c0_1 = arith.constant 0 : index
    %3 = vector.load %arg4[%c0, %c0_1] : memref<8x32xbf16, #tpu.memory_space<vmem>>, vector<8x32xbf16>
    %c0_2 = arith.constant 0 : index
    %c0_3 = arith.constant 0 : index
    %4 = vector.load %arg6[%c0_2, %c0_3] : memref<32x512xbf16, #tpu.memory_space<vmem>>, vector<32x512xbf16>
    %cst = arith.constant dense<0.000000e+00> : vector<8x512xf32>
    %5 = tpu.matmul %3, %4, %cst {dimension_numbers = #tpu.dot_dimension_numbers<[1], [0], [0], [1], [0, 0, 1, 1], [], []>} : vector<8x32xbf16>, vector<32x512xbf16>, vector<8x512xf32> -> vector<8x512xf32>
    %6 = arith.index_cast %arg0 : i32 to index
    %c0_4 = arith.constant 0 : index
    %7 = vector.load %arg7[%6, %c0_4] : memref<4x512xf32, #tpu.memory_space<vmem>>, vector<1x512xf32>
    %8 = vector.broadcast %7 : vector<1x512xf32> to vector<8x512xf32>
    %9 = arith.addf %5, %8 : vector<8x512xf32>
    %10 = vector.extract_strided_slice %9 {offsets = [0, 0], sizes = [8, 128], strides = [1, 1]} : vector<8x512xf32> to vector<8x128xf32>
    %11 = vector.extract_strided_slice %9 {offsets = [0, 128], sizes = [8, 128], strides = [1, 1]} : vector<8x512xf32> to vector<8x128xf32>
    %12 = vector.extract_strided_slice %9 {offsets = [0, 256], sizes = [8, 128], strides = [1, 1]} : vector<8x512xf32> to vector<8x128xf32>
    %13 = vector.extract_strided_slice %9 {offsets = [0, 384], sizes = [8, 128], strides = [1, 1]} : vector<8x512xf32> to vector<8x128xf32>
    %14 = arith.maximumf %10, %11 : vector<8x128xf32>
    %15 = arith.maximumf %14, %12 : vector<8x128xf32>
    %16 = arith.maximumf %15, %13 : vector<8x128xf32>
    %c0_5 = arith.constant 0 : index
    %c0_6 = arith.constant 0 : index
    %17 = vector.load %arg10[%c0_5, %c0_6] : memref<8x128xf32, #tpu.memory_space<vmem>>, vector<8x128xf32>
    %18 = arith.maximumf %17, %16 : vector<8x128xf32>
    %19 = arith.subf %10, %18 : vector<8x128xf32>
    %20 = math.exp %19 : vector<8x128xf32>
    %21 = arith.subf %11, %18 : vector<8x128xf32>
    %22 = math.exp %21 : vector<8x128xf32>
    %23 = arith.addf %20, %22 : vector<8x128xf32>
    %24 = arith.subf %12, %18 : vector<8x128xf32>
    %25 = math.exp %24 : vector<8x128xf32>
    %26 = arith.addf %23, %25 : vector<8x128xf32>
    %27 = arith.subf %13, %18 : vector<8x128xf32>
    %28 = math.exp %27 : vector<8x128xf32>
    %29 = arith.addf %26, %28 : vector<8x128xf32>
    %c0_7 = arith.constant 0 : index
    %c0_8 = arith.constant 0 : index
    %30 = vector.load %arg11[%c0_7, %c0_8] : memref<8x128xf32, #tpu.memory_space<vmem>>, vector<8x128xf32>
    %31 = arith.subf %17, %18 : vector<8x128xf32>
    %32 = math.exp %31 : vector<8x128xf32>
    %33 = arith.mulf %30, %32 : vector<8x128xf32>
    %34 = arith.addf %33, %29 : vector<8x128xf32>
    %c0_9 = arith.constant 0 : index
    %c0_10 = arith.constant 0 : index
    %35 = vector.load %arg11[%c0_9, %c0_10] : memref<8x128xf32, #tpu.memory_space<vmem>>, vector<8x128xf32>
    tpu.vector_store %arg11[%c0_9, %c0_10], %34 {strides = array<i32>} : memref<8x128xf32, #tpu.memory_space<vmem>>, vector<8x128xf32>,
    %c0_11 = arith.constant 0 : index
    %c0_12 = arith.constant 0 : index
    %36 = vector.load %arg10[%c0_11, %c0_12] : memref<8x128xf32, #tpu.memory_space<vmem>>, vector<8x128xf32>
    tpu.vector_store %arg10[%c0_11, %c0_12], %18 {strides = array<i32>} : memref<8x128xf32, #tpu.memory_space<vmem>>, vector<8x128xf32>,
    %37 = tpu.iota {dimensions = array<i32: 1>} : vector<8x128xi32>
    %c0_13 = arith.constant 0 : index
    %c0_14 = arith.constant 0 : index
    %38 = vector.load %arg3[%c0_13, %c0_14] : memref<8x1xi32, #tpu.memory_space<vmem>>, vector<8x1xi32>
    %c512_i32 = arith.constant 512 : i32
    %39 = arith.muli %arg0, %c512_i32 : i32
    %40 = vector.broadcast %39 : i32 to vector<8x1xi32>
    %41 = arith.subi %38, %40 : vector<8x1xi32>
    %c0_15 = arith.constant 0 : index
    %c0_16 = arith.constant 0 : index
    %42 = vector.load %arg12[%c0_15, %c0_16] : memref<8x128xf32, #tpu.memory_space<vmem>>, vector<8x128xf32>
    %c0_i32_17 = arith.constant 0 : i32
    %43 = vector.broadcast %c0_i32_17 : i32 to vector<8x1xi32>
    %44 = arith.subi %41, %43 : vector<8x1xi32>
    %45 = vector.broadcast %44 : vector<8x1xi32> to vector<8x128xi32>
    %46 = arith.cmpi eq, %37, %45 : vector<8x128xi32>
    %cst_18 = arith.constant 0.000000e+00 : f32
    %47 = vector.broadcast %cst_18 : f32 to vector<8x128xf32>
    %48 = arith.select %46, %10, %47 : vector<8x128xi1>, vector<8x128xf32>
    %49 = arith.addf %42, %48 : vector<8x128xf32>
    %c128_i32 = arith.constant 128 : i32
    %50 = vector.broadcast %c128_i32 : i32 to vector<8x1xi32>
    %51 = arith.subi %41, %50 : vector<8x1xi32>
    %52 = vector.broadcast %51 : vector<8x1xi32> to vector<8x128xi32>
    %53 = arith.cmpi eq, %37, %52 : vector<8x128xi32>
    %cst_19 = arith.constant 0.000000e+00 : f32
    %54 = vector.broadcast %cst_19 : f32 to vector<8x128xf32>
    %55 = arith.select %53, %11, %54 : vector<8x128xi1>, vector<8x128xf32>
    %56 = arith.addf %49, %55 : vector<8x128xf32>
    %c256_i32 = arith.constant 256 : i32
    %57 = vector.broadcast %c256_i32 : i32 to vector<8x1xi32>
    %58 = arith.subi %41, %57 : vector<8x1xi32>
    %59 = vector.broadcast %58 : vector<8x1xi32> to vector<8x128xi32>
    %60 = arith.cmpi eq, %37, %59 : vector<8x128xi32>
    %cst_20 = arith.constant 0.000000e+00 : f32
    %61 = vector.broadcast %cst_20 : f32 to vector<8x128xf32>
    %62 = arith.select %60, %12, %61 : vector<8x128xi1>, vector<8x128xf32>
    %63 = arith.addf %56, %62 : vector<8x128xf32>
    %c384_i32 = arith.constant 384 : i32
    %64 = vector.broadcast %c384_i32 : i32 to vector<8x1xi32>
    %65 = arith.subi %41, %64 : vector<8x1xi32>
    %66 = vector.broadcast %65 : vector<8x1xi32> to vector<8x128xi32>
    %67 = arith.cmpi eq, %37, %66 : vector<8x128xi32>
    %cst_21 = arith.constant 0.000000e+00 : f32
    %68 = vector.broadcast %cst_21 : f32 to vector<8x128xf32>
    %69 = arith.select %67, %13, %68 : vector<8x128xi1>, vector<8x128xf32>
    %70 = arith.addf %63, %69 : vector<8x128xf32>
    %c0_22 = arith.constant 0 : index
    %c0_23 = arith.constant 0 : index
    %71 = vector.load %arg12[%c0_22, %c0_23] : memref<8x128xf32, #tpu.memory_space<vmem>>, vector<8x128xf32>
    tpu.vector_store %arg12[%c0_22, %c0_23], %70 {strides = array<i32>} : memref<8x128xf32, #tpu.memory_space<vmem>>, vector<8x128xf32>,
    %c3_i32 = arith.constant 3 : i32
    %72 = arith.cmpi eq, %arg0, %c3_i32 : i32
    %73 = arith.extui %72 : i1 to i32
    %c0_i32_24 = arith.constant 0 : i32
    %74 = arith.cmpi ne, %73, %c0_i32_24 : i32
    scf.if %74 {
      %c0_25 = arith.constant 0 : index
      %c0_26 = arith.constant 0 : index
      %75 = vector.load %arg10[%c0_25, %c0_26] : memref<8x128xf32, #tpu.memory_space<vmem>>, vector<8x128xf32>
      %cst_27 = arith.constant dense<0xFF800000> : vector<8xf32>
      %76 = vector.multi_reduction <maximumf>, %75, %cst_27 [1] : vector<8x128xf32> to vector<8xf32>
      %77 = vector.shape_cast %76 : vector<8xf32> to vector<8x1xf32>
      %c0_28 = arith.constant 0 : index
      %c0_29 = arith.constant 0 : index
      %78 = vector.load %arg11[%c0_28, %c0_29] : memref<8x128xf32, #tpu.memory_space<vmem>>, vector<8x128xf32>
      %79 = vector.broadcast %77 : vector<8x1xf32> to vector<8x128xf32>
      %80 = arith.subf %75, %79 : vector<8x128xf32>
      %81 = math.exp %80 : vector<8x128xf32>
      %82 = arith.mulf %78, %81 : vector<8x128xf32>
      %cst_30 = arith.constant dense<0.000000e+00> : vector<8xf32>
      %83 = vector.multi_reduction <add>, %82, %cst_30 [1] : vector<8x128xf32> to vector<8xf32>
      %84 = vector.shape_cast %83 : vector<8xf32> to vector<8x1xf32>
      %85 = math.log %84 : vector<8x1xf32>
      %86 = arith.addf %77, %85 : vector<8x1xf32>
      %c0_31 = arith.constant 0 : index
      %c0_32 = arith.constant 0 : index
      %87 = vector.load %arg12[%c0_31, %c0_32] : memref<8x128xf32, #tpu.memory_space<vmem>>, vector<8x128xf32>
      %cst_33 = arith.constant dense<0.000000e+00> : vector<8xf32>
      %88 = vector.multi_reduction <add>, %87, %cst_33 [1] : vector<8x128xf32> to vector<8xf32>
      %89 = vector.shape_cast %88 : vector<8xf32> to vector<8x1xf32>
      %90 = arith.subf %89, %86 : vector<8x1xf32>
      %91 = vector.shape_cast %90 : vector<8x1xf32> to vector<1x8x1xf32>
      %cst_34 = arith.constant dense<0.000000e+00> : vector<1xf32>
      %92 = vector.multi_reduction <add>, %91, %cst_34 [1, 2] : vector<1x8x1xf32> to vector<1xf32>
      %93 = vector.shape_cast %92 : vector<1xf32> to vector<1x1x1xf32>
      %94 = vector.extract %93[0, 0, 0] : f32 from vector<1x1x1xf32>
      %95 = vector.broadcast %94 : f32 to vector<1x1xf32>
      %c0_35 = arith.constant 0 : index
      %c0_36 = arith.constant 0 : index
      %96 = vector.load %arg5[%c0_35, %c0_36] : memref<8x32xf32, #tpu.memory_space<vmem>>, vector<1x32xf32>
      %c0_37 = arith.constant 0 : index
      %c0_38 = arith.constant 0 : index
      %97 = vector.load %arg8[%c0_37, %c0_38] : memref<1x32xf32, #tpu.memory_space<vmem>>, vector<1x32xf32>
      %98 = arith.mulf %96, %97 : vector<1x32xf32>
      %cst_39 = arith.constant dense<0.000000e+00> : vector<1xf32>
      %99 = vector.multi_reduction <add>, %98, %cst_39 [1] : vector<1x32xf32> to vector<1xf32>
      %100 = vector.shape_cast %99 : vector<1xf32> to vector<1x1xf32>
      %c0_40 = arith.constant 0 : index
      %101 = memref.load %arg2[%c0_40] : memref<1xf32, #tpu.memory_space<smem>>
      %102 = vector.broadcast %101 : f32 to vector<1x1xf32>
      %103 = arith.addf %100, %102 : vector<1x1xf32>
      %cst_41 = arith.constant 0.000000e+00 : f32
      %104 = vector.broadcast %cst_41 : f32 to vector<1x1xf32>
      %105 = arith.subf %104, %103 : vector<1x1xf32>
      %cst_42 = arith.constant 3.000000e+00 : f32
      %106 = math.log %cst_42 : f32
      %cst_43 = arith.constant 7.000000e+00 : f32
      %107 = math.log %cst_43 : f32
      %108 = vector.broadcast %107 : f32 to vector<1x1xf32>
      %109 = arith.addf %108, %95 : vector<1x1xf32>
      %110 = vector.broadcast %106 : f32 to vector<1x1xf32>
      %111 = arith.addf %110, %105 : vector<1x1xf32>
      %112 = arith.subf %109, %111 : vector<1x1xf32>
      %cst_44 = arith.constant 0.000000e+00 : f32
      %113 = vector.broadcast %cst_44 : f32 to vector<1x1xf32>
      %114 = arith.maximumf %112, %113 : vector<1x1xf32>
      %115 = math.absf %112 : vector<1x1xf32>
      %cst_45 = arith.constant 0.000000e+00 : f32
      %116 = vector.broadcast %cst_45 : f32 to vector<1x1xf32>
      %117 = arith.subf %116, %115 : vector<1x1xf32>
      %118 = math.exp %117 : vector<1x1xf32>
      %cst_46 = arith.constant 1.000000e+00 : f32
      %119 = vector.broadcast %cst_46 : f32 to vector<1x1xf32>
      %120 = arith.addf %119, %118 : vector<1x1xf32>
      %121 = math.log %120 : vector<1x1xf32>
      %122 = arith.addf %114, %121 : vector<1x1xf32>
      %cst_47 = arith.constant 0.000000e+00 : f32
      %123 = vector.broadcast %cst_47 : f32 to vector<1x1xf32>
      %124 = arith.subf %123, %112 : vector<1x1xf32>
      %cst_48 = arith.constant 0.000000e+00 : f32
      %125 = vector.broadcast %cst_48 : f32 to vector<1x1xf32>
      %126 = arith.maximumf %124, %125 : vector<1x1xf32>
      %127 = math.absf %124 : vector<1x1xf32>
      %cst_49 = arith.constant 0.000000e+00 : f32
      %128 = vector.broadcast %cst_49 : f32 to vector<1x1xf32>
      %129 = arith.subf %128, %127 : vector<1x1xf32>
      %130 = math.exp %129 : vector<1x1xf32>
      %cst_50 = arith.constant 1.000000e+00 : f32
      %131 = vector.broadcast %cst_50 : f32 to vector<1x1xf32>
      %132 = arith.addf %131, %130 : vector<1x1xf32>
      %133 = math.log %132 : vector<1x1xf32>
      %134 = arith.addf %126, %133 : vector<1x1xf32>
      %c0_51 = arith.constant 0 : index
      %135 = memref.load %arg1[%c0_51] : memref<1xi32, #tpu.memory_space<smem>>
      %c0_i32_52 = arith.constant 0 : i32
      %136 = arith.cmpi sgt, %135, %c0_i32_52 : i32
      %137 = arith.select %136, %122, %134 : vector<1x1xf32>
      %c0_53 = arith.constant 0 : index
      %c0_54 = arith.constant 0 : index
      %138 = vector.load %arg9[%c0_53, %c0_54] : memref<1x1xf32, #tpu.memory_space<vmem>>, vector<1x1xf32>
      tpu.vector_store %arg9[%c0_53, %c0_54], %137 {strides = array<i32>} : memref<1x1xf32, #tpu.memory_space<vmem>>, vector<1x1xf32>,
    } else {
    }
    return
  }
  func.func @transform_0(%arg0: i32) -> i32 {
    %c0_i32 = arith.constant 0 : i32
    %c0_i32_0 = arith.constant 0 : i32
    return %c0_i32 : i32
  }
  func.func @transform_1(%arg0: i32) -> i32 {
    %c0_i32 = arith.constant 0 : i32
    %c0_i32_0 = arith.constant 0 : i32
    return %c0_i32 : i32
  }
  func.func @transform_2(%arg0: i32) -> (i32, i32) {
    %c0_i32 = arith.constant 0 : i32
    %c0_i32_0 = arith.constant 0 : i32
    %c0_i32_1 = arith.constant 0 : i32
    return %c0_i32, %c0_i32_0 : i32, i32
  }
  func.func @transform_3(%arg0: i32) -> (i32, i32) {
    %c0_i32 = arith.constant 0 : i32
    %c0_i32_0 = arith.constant 0 : i32
    %c0_i32_1 = arith.constant 0 : i32
    return %c0_i32, %c0_i32_0 : i32, i32
  }
  func.func @transform_4(%arg0: i32) -> (i32, i32) {
    %c0_i32 = arith.constant 0 : i32
    %c0_i32_0 = arith.constant 0 : i32
    %c0_i32_1 = arith.constant 0 : i32
    return %c0_i32, %c0_i32_0 : i32, i32
  }
  func.func @transform_5(%arg0: i32) -> (i32, i32) {
    %c0_i32 = arith.constant 0 : i32
    %c0_i32_0 = arith.constant 0 : i32
    return %c0_i32, %arg0 : i32, i32
  }
  func.func @transform_6(%arg0: i32) -> (i32, i32) {
    %c0_i32 = arith.constant 0 : i32
    %c0_i32_0 = arith.constant 0 : i32
    %c0_i32_1 = arith.constant 0 : i32
    return %c0_i32, %c0_i32_0 : i32, i32
  }
  func.func @transform_7(%arg0: i32) -> (i32, i32) {
    %c0_i32 = arith.constant 0 : i32
    %c0_i32_0 = arith.constant 0 : i32
    %c0_i32_1 = arith.constant 0 : i32
    return %c0_i32, %c0_i32_0 : i32, i32
  }
  func.func @transform_8(%arg0: i32) -> (i32, i32) {
    %c0_i32 = arith.constant 0 : i32
    %c0_i32_0 = arith.constant 0 : i32
    %c0_i32_1 = arith.constant 0 : i32
    return %c0_i32, %c0_i32_0 : i32, i32
  }
}

</mosaic_0001>

<bundles_post_ra>
// kernel: tpu_custom_call.1
= control target key start
LH: loop header
LB: loop body
LE: loop exit
PB: predicated region body
PF: predicated region fallthrough
CT: control target
= control target key end

     0   :  { %s1239_s0 = inlined_call_operand.<no memory space> [shape: s32[1], index: 0, kind: input, shape index: {}]   ;;  %s1240_s1 = inlined_call_operand.<no memory space> [shape: f32[1], index: 1, kind: input, shape index: {}]   ;;  %s1241_s2 = inlined_call_operand.vmem [shape: s32[8,1], index: 2, kind: input, shape index: {}]   ;;  %s1242_s3 = inlined_call_operand.hbm [shape: bf16[8,32], index: 3, kind: input, shape index: {}]   ;;  %s1243_s4 = inlined_call_operand.hbm [shape: f32[8,32], index: 4, kind: input, shape index: {}]   ;;  %s1244_s5 = inlined_call_operand.hbm [shape: bf16[32,2048], index: 5, kind: input, shape index: {}]   ;;  %s1245_s6 = inlined_call_operand.vmem [shape: f32[4,512], index: 6, kind: input, shape index: {}]   ;;  %s1246_s7 = inlined_call_operand.vmem [shape: f32[1,32], index: 7, kind: input, shape index: {}]   ;;  %s1247_s8 = inlined_call_operand.hbm [shape: f32[1,1], index: 8, kind: output, shape index: {}]  }
   0x1   :  { %13 = sst [smem:[#allocation5]] %s1239_s0 }
   0x2   :  { %14 = sst [smem:[#allocation6]] %s1240_s1 }
   0x3   :  { %15 = vsyncpa [#allocation8], 0 }
   0x4   :  { %16 = vsyncpa [#allocation11], 0 }
   0x5   :  { %17 = vsyncpa [#allocation9], 0  ;;  %s1088_s9 = smov 0   ;;  %s1090_s10 = smov 0  }
   0x6   :  { %s1092_s11 = smov 0   ;;  %s1094_s12 = smov 0  }
   0x7 LB: > { %s1107_s0 = sadd.s32 4294967295, %s1026_s12   ;;  %s1110_s1 = sadd.s32 1, %s1026_s12   ;;  %s1026_s12 = sphi %s1094_s12, %s1255_s12   ;;  %s1022_s11 = sphi %s1092_s11, %s1254_s11   ;;  %s1018_s10 = sphi %s1090_s10, %s1253_s10   ;;  %s1014_s9 = sphi %s1088_s9, %s1252_s9  }
   0x8   : > { %s132_s13 = ssub.s32 %s1026_s12, %s1110_s1  ;;  %s135_s14 = sadd.s32 1, %s1022_s11 }
   0x9   : > { %p133_p0 = scmp.eq.s32.totalorder %s132_s13, 0  ;;  %p142_p1 = scmp.ne.s32.totalorder %s1022_s11, %s1018_s10 }
   0xa   : > { %p143_p2 = scmp.eq.s32.totalorder %s1026_s12, 0  ;;  %p148_p3 = scmp.ne.s32.totalorder %s1018_s10, %s1014_s9 }
   0xb   : > { %s1120_s15 = scalar_select %p133_p0, %s1022_s11, %s135_s14  }
   0xc   : > { %p1122_p4 = por %p143_p2, %p142_p1  ;;  %p149_p5 = scmp.eq.s32.totalorder %s1107_s0, 0 }
   0xd   : > { %p694_p6 = scmp.ge.s32.totalorder %s1026_s12, 1  ;;  %p222_p7 = scmp.lt.s32.totalorder %s1026_s12, 5 }
   0xe   : > { %p1131_p8 = por %p149_p5, %p148_p3  ;;  %p695_p9 = scmp.ne.s32.totalorder %s1107_s0, 0 }
   0xf   : > { %p1136_p10 = pnand %p694_p6, %p222_p7  ;;  %s243_s21 = sshll.u32 %s1242_s3, 4  ;;  %s244_s21 = int_to_ptr.hbm [resolvable:$true] %s243_s21 }
  0x10   : > { %s1028_s22 = smov [#allocation7]   ;;  %p792_p13 = scmp.lt.s32.totalorder %s1026_s12, 4 }
  0x11   : > { %p779_p11 = pneg %p1136_p10  ;;  %s245_s23 = sshll.u32 %s1028_s22, 4  ;;  %s246_s23 = int_to_ptr.vmem [resolvable:$true] %s245_s23 }
  0x12   : > { %s255_s26 = sshll.u32 %s1243_s4, 4  ;;  %p1153_p0 = pnand %p792_p13, %p1122_p4  ;;  %s256_s26 = int_to_ptr.hbm [resolvable:$true] %s255_s26 }
  0x13   : > { %p780_p12 = pnand %p779_p11, %p149_p5  ;;  %s1029_s28 = smov [#allocation10]  }
  0x14   : > { %s257_s29 = sshll.u32 %s1029_s28, 4  ;;  %s274_s30 = sand.u32 1, %s1026_s12   ;;  %s258_s29 = int_to_ptr.vmem [resolvable:$true] %s257_s29 }
  0x15   : > { %782 = dma.hbm_to_vmem [thread:$0]  (!%p780_p12), %s244_s21, 64, %s246_s23, [#allocation8]  }
  0x16   : > { %785 = dma.hbm_to_vmem [thread:$0]  (!%p780_p12), %s256_s26, 128, %s258_s29, [#allocation11]  }
  0x17   : > { %s276_s9 = sand.u32 1, %s1022_s11   ;;  %s753_s13 = sshll.u32 %s1026_s12, 4 }
  0x18   : > { %s698_s14 = sshll.u32 %s276_s9, 6  ;;  %s283_s22 = scalar_lea.hbm %s1244_s5, %s753_s13 }
  0x19   : > { %s284_s16 = sshll.u32 %s283_s22, 4  ;;  %s278_s24 = scalar_lea.vmem [#allocation12], %s698_s14  ;;  %s285_s16 = int_to_ptr.hbm [resolvable:$true] %s284_s16 }
  0x1a   : > { %s286_s25 = sshll.u32 %s278_s24, 4  ;;  %s275_s21 = scalar_lea.sflag [#allocation8], %s274_s30  ;;  %s287_s25 = int_to_ptr.vmem [resolvable:$true] %s286_s25 }
  0x1b   : > { %s922_s23 = sshra.s32 %s285_s16, 4  ;;  %p926_p2 = pneg %p1153_p0  ;;  %s923_s23 = int_to_ptr.hbm [resolvable:$true] %s922_s23 }
  0x1c   : > { %s924_s28 = scalar_lea.hbm %s923_s23, 64  ;;  %s929_s29 = scalar_lea.hbm %s1244_s5, 256 }
  0x1d   : > { %p925_p1 = scmp.ne.s32.totalorder %s923_s23, %s924_s28  ;;  %p930_p6 = scmp.lt.s32.totalorder %s923_s23, %s1244_s5 }
  0x1e   : > { %p931_p7 = scmp.lt.s32.totalorder %s929_s29, %s924_s28 }
  0x1f   : > { %p927_p3 = pnand %p926_p2, %p925_p1 }
  0x20   : > { %p932_p11 = por %p931_p7, %p930_p6 }
  0x21   : > { %p928_p4 = pneg %p927_p3 }
  0x23   : > { %p933_p12 = pnand %p932_p11, %p928_p4 }
  0x25   : > { %936 = shalt.err (!%p933_p12)
}
  0x26   : > { %s1030_s30 = smov 1024   ;;  %s1031_s14 = smov 256  }
  0x27   : > { %s1032_s19 = smov 16   ;;  %298 = sbr.rel (%p1136_p10) target bundleno = 710 (0x2c6), region = 52 }
  0x28   : > { %789 = dma.hbm_to_vmem [thread:$0]  (!%p1153_p0), %s285_s16, 1024, %s287_s25, %s275_s21, %s1030_s30, %s1031_s14, %s1032_s19  }
  0x2c   : > { %997 = dma.done.wait (%p149_p5), [#allocation8], 64  }
  0x2d   : > { %999 = vsyncadd (%p149_p5), [#allocation8], 4294967232 }
  0x2e   : > { %1001 = dma.done.wait (%p149_p5), [#allocation11], 128  }
  0x2f   : > { %1003 = vsyncadd (%p149_p5), [#allocation11], 4294967168  ;;  %s310_s27 = sand.u32 1, %s1107_s0   ;;  %s312_s20 = sand.u32 1, %s1018_s10  }
  0x30   : > { %s704_s22 = sshll.u32 %s312_s20, 6  ;;  %s311_s18 = scalar_lea.sflag [#allocation8], %s310_s27 }
  0x31   : > { %s1185_s16 = scalar_lea.vmem [#allocation12], %s704_s22 }
  0x32   : > { %1005 = dma.done.wait (%p1131_p8), %s311_s18, 1024  }
  0x33   : > { %1007 = vsyncadd (%p1131_p8), %s311_s18, 4294966272  ;;  %348 = sbr.rel (%p695_p9) target bundleno = 60 (0x3c), region = 68 }
  0x38   : > { %v1033_v0 = vmov -inf   ;;  %v1034_v1 = vmov 0.0  }
  0x39   : > { %349 = vst [vmem:[#allocation2] sm:$0xff] %v1033_v0 }
  0x3a   : > { %350 = vst [vmem:[#allocation3] sm:$0xff] %v1034_v1 }
  0x3b   : > { %351 = vst [vmem:[#allocation4] sm:$0xff] %v1034_v1 }
  0x3c PF: > { %v726_v2 = vld [vmem:[%s1185_s16 + $0x20] sm:$0xf]  ;;  %v760_v3 = vld [vmem:[%s1185_s16 + $0x2c] sm:$0xf0]  ;;  %v758_v4 = vld [vmem:[%s1185_s16 + $0x24] sm:$0xf]  ;;  %v503_v35 = vlaneseq }
  0x3d   : > { %v727_v5 = vor.u32 %v760_v3, %v726_v2  ;;  %v728_v6 = vld [vmem:[%s1185_s16 + $0x30] sm:$0xf0]  ;;  %v734_v7 = vld [vmem:[%s1185_s16 + $0x28] sm:$0xf]  ;;  %v761_v8 = vld [vmem:[%s1185_s16 + $0x34] sm:$0xf0] }
  0x3e   : > { %v731_v9 = vor.u32 %v758_v4, %v728_v6  ;;  %v735_v10 = vor.u32 %v761_v8, %v734_v7  ;;  %v759_v11 = vld [vmem:[%s1185_s16 + $0x2c] sm:$0xf]  ;;  %v736_v12 = vld [vmem:[%s1185_s16 + $0x38] sm:$0xf0]  ;;  %v710_v13 = vld [vmem:[%s1185_s16] sm:$0xf] }
  0x3f   : > { %429 = vmatpush.bf16.msra.mxu0 %v727_v5  ;;  %v739_v14 = vor.u32 %v759_v11, %v736_v12  ;;  %v756_v15 = vld [vmem:[%s1185_s16 + $0xc] sm:$0xf0]  ;;  %v754_v16 = vld [vmem:[%s1185_s16 + $0x4] sm:$0xf]  ;;  %v712_v17 = vld [vmem:[%s1185_s16 + $0x10] sm:$0xf0] }
  0x40   : > { %442 = vmatpush.bf16.msra.mxu1 %v731_v9  ;;  %455 = vmatpush.bf16.msra.mxu2 %v735_v10  ;;  %v711_v18 = vor.u32 %v756_v15, %v710_v13  ;;  %v715_v19 = vor.u32 %v754_v16, %v712_v17  ;;  %v718_v20 = vld [vmem:[%s1185_s16 + $0x8] sm:$0xf]  ;;  %v757_v21 = vld [vmem:[%s1185_s16 + $0x14] sm:$0xf0]  ;;  %v755_v22 = vld [vmem:[%s1185_s16 + $0xc] sm:$0xf] }
  0x41   : > { %468 = vmatpush.bf16.msra.mxu3 %v739_v14  ;;  %v719_v23 = vor.u32 %v757_v21, %v718_v20  ;;  %v720_v24 = vld [vmem:[%s1185_s16 + $0x18] sm:$0xf0]  ;;  %v1035_v26 = vmov 0   ;;  %s744_s25 = sshll.u32 %s1107_s0, 9  ;;  %v352_v28 = vld [vmem:[#allocation7] sm:$0xf] }
  0x42   : > { %v723_v25 = vor.u32 %v755_v22, %v720_v24  ;;  %838 = vset.pattern.permute.xlu0 %v1035_v26  ;;  %v505_v27 = vld [vmem:[%s1241_s2] sm:$0xff]  ;;  %839 = vset.pattern.permute.xlu1 %v1035_v26  ;;  %vm419_vm0 = vcmask 261120   ;;  %v507_v29 = vstv %s744_s25  ;;  %s361_s21 = sshra.s32 %s1107_s0, 2  ;;  %s364_s23 = sand.u32 3, %s1107_s0  ;;  %v504_v38 = vand.u32 127, %v503_v35  ;;  %v509_v45 = vld [vmem:[#allocation4] sm:$0xff] }
  0x43   : > { %430 = vmatpush.bf16.msra.mxu0 %v711_v18  ;;  %v508_v30 = vsub.s32 %v505_v27, %v507_v29  ;;  %s762_s28 = sshll.u32 %s361_s21, 4  ;;  %v478_v63 = vld [vmem:[#allocation2] sm:$0xff]  ;;  %v495_v21 = vld [vmem:[#allocation3] sm:$0xff]  ;;  %p748_p5 = scmp.ne.s32.totalorder %s1107_s0, 3 }
  0x44   : > { %443 = vmatpush.bf16.msra.mxu1 %v715_v19  ;;  %456 = vmatpush.bf16.msra.mxu2 %v719_v23  ;;  %s367_s12 = sadd.s32 %s762_s28, %s364_s23  ;;  %s578_s14 = sld [smem:[#allocation6]] (!%p748_p5) }
  0x45   : > { %469 = vmatpush.bf16.msra.mxu3 %v723_v25  ;;  %511 = vperm.xlu0 %838, %v508_v30   ;;  %v746_v31 = vadd.s32 4294967040, %v508_v30  ;;  %v745_v32 = vadd.s32 4294967168, %v508_v30  ;;  %v747_v33 = vadd.s32 4294966912, %v508_v30  ;;  %s368_s9 = scalar_lea.vmem %s1245_s6, %s367_s12  ;;  %s604_s27 = sld [smem:[#allocation5]] (!%p748_p5) }
  0x46   : > { %740 = vmatmul.msk.bf16.vlgmr.msra.gmra.mxu0 %vm419_vm0, %v352_v28  ;;  %v369_v36 = vld [vmem:[%s368_s9] ss:$4 sm:$0xf] }
  0x47   : > { %741 = vmatmul.msk.bf16.vlgmr.msra.gmra.mxu1 %vm419_vm0, %v352_v28  ;;  %742 = vmatmul.msk.bf16.vlgmr.msra.gmra.mxu2 %vm419_vm0, %v352_v28  ;;  %v371_v39 = vperm.slane %v369_v36, 0  ;;  %v372_v40 = vperm.slane %v369_v36, 1  ;;  %v373_v50 = vperm.slane %v369_v36, 2  ;;  %v374_v51 = vperm.slane %v369_v36, 3 }
  0x48   : > { %743 = vmatmul.msk.bf16.vlgmr.msra.gmra.mxu3 %vm419_vm0, %v352_v28  ;;  %525 = vperm.xlu1 %839, %v746_v31  }
  0x4b   : > { %p605_p8 = scmp.gt.s32.totalorder (!%p748_p5), %s604_s27, 0 }
  0x4d   : > { %518 = vperm.xlu0 %838, %v745_v32  }
  0x50   : > { %532 = vperm.xlu1 %839, %v747_v33  }
  0xb7   : > { %v512_v34 = vpop.permute.xlu0 %511 }
  0xb8   : > { %vm513_vm1 = vcmp.eq.s32.totalorder %v504_v38, %v512_v34 }
  0xba   : > { %v526_v37 = vpop.permute.xlu1 %525 }
  0xbb   : > { %vm527_vm3 = vcmp.eq.s32.totalorder %v504_v38, %v526_v37 }
  0xbf   : > { %v519_v41 = vpop.permute.xlu0 %518 }
  0xc0   : > { %vm520_vm2 = vcmp.eq.s32.totalorder %v504_v38, %v519_v41 }
  0xc2   : > { %v533_v52 = vpop.permute.xlu1 %532 }
  0xc3   : > { %v432_v42 = vpop.f32.mrf.mxu0  ;;  %vm534_vm4 = vcmp.eq.s32.totalorder %v504_v38, %v533_v52 }
  0xc4   : > { %v433_v43 = vadd.f32 %v432_v42, %v371_v39  ;;  %v445_v44 = vpop.f32.mrf.mxu1 }
  0xc5   : > { %v446_v46 = vadd.f32 %v445_v44, %v372_v40 }
  0xc6   : > { %v514_v47 = vsel %vm513_vm1, %v433_v43, 0.0 }
  0xc7   : > { %v515_v48 = vadd.f32 %v514_v47, %v509_v45  ;;  %v521_v49 = vsel %vm520_vm2, %v446_v46, 0.0  ;;  %v475_v53 = vmax.f32 %v433_v43, %v446_v46 }
  0xc9   : > { %v522_v54 = vadd.f32 %v521_v49, %v515_v48 }
  0xca   : > { %v458_v55 = vpop.f32.mrf.mxu2 }
  0xcb   : > { %v459_v56 = vadd.f32 %v458_v55, %v373_v50  ;;  %v471_v57 = vpop.f32.mrf.mxu3  ;;  %v434_v58 = vpop.f32.mrf.mxu0 }
  0xcc   : > { %v472_v59 = vadd.f32 %v471_v57, %v374_v51  ;;  %v447_v60 = vpop.f32.mrf.mxu1 }
  0xcd   : > { %v476_v61 = vmax.f32 %v475_v53, %v459_v56  ;;  %v528_v62 = vsel %vm527_vm3, %v459_v56, 0.0 }
  0xce   : > { %v529_v0 = vadd.f32 %v528_v62, %v522_v54  ;;  %v535_v1 = vsel %vm534_vm4, %v472_v59, 0.0 }
  0xcf   : > { %v477_v2 = vmax.f32 %v476_v61, %v472_v59 }
  0xd0   : > { %v536_v3 = vadd.f32 %v535_v1, %v529_v0 }
  0xd1   : > { %v479_v4 = vmax.f32 %v478_v63, %v477_v2 }
  0xd2   : > { %537 = vst [vmem:[#allocation4] sm:$0xff] %v536_v3  ;;  %v460_v5 = vpop.f32.mrf.mxu2 }
  0xd3   : > { %v480_v6 = vsub.f32 %v433_v43, %v479_v4  ;;  %v483_v7 = vsub.f32 %v446_v46, %v479_v4  ;;  %v487_v8 = vsub.f32 %v459_v56, %v479_v4  ;;  %502 = vst [vmem:[#allocation2] sm:$0xff] %v479_v4  ;;  %v473_v9 = vpop.f32.mrf.mxu3  ;;  %v491_v10 = vsub.f32 %v472_v59, %v479_v4 }
  0xd4   : > { %v496_v11 = vsub.f32 %v478_v63, %v479_v4 }
  0xd5   : > { %v481_v12 = vmul.f32 1.442695, %v480_v6  ;;  %v484_v13 = vmul.f32 1.442695, %v483_v7  ;;  %v488_v14 = vmul.f32 1.442695, %v487_v8 }
  0xd6   : > { %v497_v15 = vmul.f32 1.442695, %v496_v11  ;;  %v492_v16 = vmul.f32 1.442695, %v491_v10 }
  0xd7   : > { %840 = vpow2.f32 %v481_v12 }
  0xd8   : > { %842 = vpow2.f32 %v484_v13 }
  0xd9   : > { %844 = vpow2.f32 %v488_v14 }
  0xda   : > { %846 = vpow2.f32 %v497_v15 }
  0xdb   : > { %848 = vpow2.f32 %v492_v16 }
  0xdd   : > { %v841_v17 = vpop.eup %840 }
  0xde   : > { %v843_v18 = vpop.eup %842 }
  0xdf   : > { %v486_v19 = vadd.f32 %v843_v18, %v841_v17  ;;  %v845_v20 = vpop.eup %844 }
  0xe0   : > { %v847_v22 = vpop.eup %846 }
  0xe1   : > { %v490_v23 = vadd.f32 %v845_v20, %v486_v19  ;;  %v849_v24 = vpop.eup %848  ;;  %v499_v26 = vmul.f32 %v847_v22, %v495_v21 }
  0xe3   : > { %v494_v25 = vadd.f32 %v849_v24, %v490_v23  ;;  %541 = sbr.rel (%p748_p5) target bundleno = 705 (0x2c1), region = 72 }
  0xe5   : > { %v500_v27 = vadd.f32 %v499_v26, %v494_v25 }
  0xe7   : > { %501 = vst [vmem:[#allocation3] sm:$0xff] %v500_v27 }
  0xe8   : > { %v542_v28 = vld [vmem:[#allocation2] sm:$0xff]  ;;  %v555_v29 = vld [vmem:[#allocation4] sm:$0xff]  ;;  %v571_v36 = vld [vmem:[#allocation10] sm:$0x1]  ;;  %vm574_vm5 = vcmask 253952   ;;  %vm559_vm6 = vcmask 7168   ;;  %v579_v54 = vstv %s578_s14 }
  0xe9   : > { %543 = vmax.xlane.f32.xlu0 %v542_v28  ;;  %556 = vadd.xlane.f32.xlu1 %v555_v29  ;;  %v572_v37 = vld [vmem:[%s1246_s7] sm:$0x1]  ;;  %s606_s20 = scalar_select %p605_p8, 1, 0  ;;  %vm610_vm8 = vcmask 0  }
  0xea   : > { %v573_v38 = vmul.f32 %v572_v37, %v571_v36 }
  0xeb   : > { %v607_v11 = vstv %s606_s20 }
  0xec   : > { %v575_v39 = vsel %vm574_vm5, %v573_v38, 0.0  ;;  %vm608_vm7 = vcmp.eq.s32.totalorder %v607_v11, 1 }
  0xed   : > { %576 = vadd.xlane.f32.xlu2 %v575_v39 }
  0xee   : > { %v545_v33 = vld [vmem:[#allocation3] sm:$0xff] }
 0x15c   : > { %v544_v30 = vpop.xlane.xlu0 %543  ;;  %v557_v43 = vpop.xlane.xlu1 %556 }
 0x15d   : > { %v546_v31 = vsub.f32 %v542_v28, %v544_v30 }
 0x15f   : > { %v547_v32 = vmul.f32 1.442695, %v546_v31 }
 0x160   : > { %v577_v55 = vpop.xlane.xlu2 %576 }
 0x161   : > { %850 = vpow2.f32 %v547_v32  ;;  %v580_v56 = vadd.f32 %v579_v54, %v577_v55 }
 0x163   : > { %v581_v57 = vsub.f32 0.0, %v580_v56 }
 0x165   : > { %v583_v58 = vadd.f32 1.0986123, %v581_v57 }
 0x167   : > { %v851_v34 = vpop.eup %850 }
 0x168   : > { %v549_v35 = vmul.f32 %v851_v34, %v545_v33 }
 0x16a   : > { %550 = vadd.xlane.f32.xlu0 %v549_v35 }
 0x1dd   : > { %v551_v40 = vpop.xlane.xlu0 %550 }
 0x1de   : > { %852 = vlog2.f32 %v551_v40 }
 0x1e4   : > { %v853_v41 = vpop.eup %852 }
 0x1e5   : > { %v553_v42 = vmul.f32 0.6931472, %v853_v41 }
 0x1e7   : > { %v554_v44 = vadd.f32 %v553_v42, %v544_v30 }
 0x1e9   : > { %v558_v45 = vsub.f32 %v557_v43, %v554_v44 }
 0x1eb   : > { %v560_v46 = vsel %vm559_vm6, %v558_v45, 0.0 }
 0x1ec   : > { %561 = vadd.xlane.f32.xlu1 %v560_v46 }
 0x25f   : > { %v562_v47 = vpop.xlane.xlu1 %561 }
 0x260   : > { %v563_v48 = vrot.slane %v562_v47, 4 }
 0x262   : > { %v564_v49 = vadd.f32 %v563_v48, %v562_v47 }
 0x264   : > { %v565_v50 = vrot.slane %v564_v49, 2 }
 0x266   : > { %v566_v51 = vadd.f32 %v565_v50, %v564_v49 }
 0x268   : > { %v567_v52 = vrot.slane %v566_v51, 1 }
 0x26a   : > { %v568_v53 = vadd.f32 %v567_v52, %v566_v51 }
 0x26c   : > { %763 = vpush %v568_v53 }
 0x29d   : > { %s764_s19 = spop %763 }
 0x29e   : > { %v570_v59 = vstv %s764_s19 }
 0x29f   : > { %v582_v60 = vadd.f32 1.9459101, %v570_v59 }
 0x2a1   : > { %v584_v61 = vsub.f32 %v582_v60, %v583_v58 }
 0x2a3   : > { %v586_v62 = vand.u32 2147483647, %v584_v61  ;;  %v594_v63 = vsub.f32 0.0, %v584_v61  ;;  %v585_v13 = vmax.f32 %v584_v61, 0.0 }
 0x2a5   : > { %v587_v0 = vsub.f32 0.0, %v586_v62  ;;  %v596_v1 = vand.u32 2147483647, %v594_v63  ;;  %v595_v14 = vmax.f32 %v594_v63, 0.0 }
 0x2a7   : > { %v588_v2 = vmul.f32 1.442695, %v587_v0  ;;  %v597_v3 = vsub.f32 0.0, %v596_v1 }
 0x2a9   : > { %854 = vpow2.f32 %v588_v2  ;;  %v598_v4 = vmul.f32 1.442695, %v597_v3 }
 0x2ab   : > { %856 = vpow2.f32 %v598_v4 }
 0x2af   : > { %v855_v5 = vpop.eup %854 }
 0x2b0   : > { %v590_v6 = vadd.f32 1.0, %v855_v5 }
 0x2b1   : > { %v857_v7 = vpop.eup %856 }
 0x2b2   : > { %858 = vlog2.f32 %v590_v6  ;;  %v600_v8 = vadd.f32 1.0, %v857_v7 }
 0x2b4   : > { %860 = vlog2.f32 %v600_v8 }
 0x2b8   : > { %v859_v9 = vpop.eup %858 }
 0x2b9   : > { %v592_v10 = vmul.f32 0.6931472, %v859_v9 }
 0x2ba   : > { %v861_v12 = vpop.eup %860 }
 0x2bb   : > { %v602_v15 = vmul.f32 0.6931472, %v861_v12  ;;  %v593_v16 = vadd.f32 %v592_v10, %v585_v13 }
 0x2bd   : > { %v603_v17 = vadd.f32 %v602_v15, %v595_v14 }
 0x2bf   : > { %v609_v18 = vsel %vm608_vm7, %v593_v16, %v603_v17 }
 0x2c0   : > { %611 = vst.msk [vmem:[#allocation13] sm:$0x1] %vm610_vm8, %v609_v18 }
 0x2c1 PF: > { %p795_p9 = scmp.eq.s32.totalorder %s1107_s0, 3  ;;  %s1036_s22 = smov [#allocation13]  }
 0x2c2   : > { %s618_s18 = sshll.u32 %s1036_s22, 4  ;;  %s620_s24 = sshll.u32 %s1247_s8, 4  ;;  %s619_s18 = int_to_ptr.vmem [resolvable:$true] %s618_s18  ;;  %s621_s24 = int_to_ptr.hbm [resolvable:$true] %s620_s24 }
 0x2c3   : > { %776 = dma.vmem_to_hbm [thread:$0]  (%p795_p9), %s619_s18, 16, %s621_s24, [#allocation9]  }
 0x2c4   : > { %1009 = dma.done.wait (%p795_p9), [#allocation9], 16  }
 0x2c5   : > { %1011 = vsyncadd (%p795_p9), [#allocation9], 4294967280 }
 0x2c6 PF: > { %p20_p10 = scmp.ge.s32.totalorder %s1110_s1, 6   ;;  %s1252_s9 = smov %s1018_s10 }
 0x2c7   : > { %s1253_s10 = smov %s1022_s11  ;;  %s1254_s11 = smov %s1120_s15 }
 0x2c8   : > { %s1255_s12 = smov %s1110_s1  ;;  %22 = sbr.rel (!%p20_p10) target bundleno = 7 (0x7), region = 105 }
 0x2cd   :  { %634 = vsyncpa [#allocation8], 1 }
 0x2ce   :  { %636 = vsyncpa [#allocation8 + $0x1], 1 }
 0x2cf   :  { %637 = vsyncpa [#allocation11], 1 }
 0x2d0   :  { %638 = vsyncpa [#allocation9], 1 }
 0x2d1   :  { %640 = vsyncpa [#allocation9 + $0x1], 1 }

</bundles_post_ra>
